<compile_context>
chip_gen: v6e
topology: v6e:2x2x1
jax: 0.10.0
libtpu: 0.0.40
codegen_flags: <defaults>
</compile_context>

<pallas_src>
import functools

import jax
import jax.numpy as jnp
from jax import lax
from jax.experimental import pallas as pl
from jax.experimental.pallas import tpu as pltpu

LANE = 128      # vreg lane width (fast batch axis)
SUBLANE = 8     # vreg sublane width
CHUNK_S = 64    # sublanes per inner chunk: 7 slabs * 64/8 = 56 vregs < 64


def pidnet_kernel(w1_ref, b1_ref, w2_ref, b2_ref, x_ref, o_ref, *, chunk_s):
    """Fused 3->10->3 MLP with ReLUs; batch mapped to (sublane, lane).

    x_ref / o_ref : (3, TILE_S, 128) f32 VMEM blocks.
    w1_ref (3,10), b1_ref (10,), w2_ref (10,3), b2_ref (3,) : SMEM scalars.
    """
    tile_s = x_ref.shape[1]
    n_chunks = tile_s // chunk_s

    # Pull all 43 weight/bias scalars out of SMEM up front so the scalar
    # loads / splats issue early on otherwise-idle scalar slots instead of
    # interleaving into the VALU-critical FMA chain.
    w1 = [[w1_ref[i, j] for j in range(10)] for i in range(3)]
    b1 = [b1_ref[j] for j in range(10)]
    w2 = [[w2_ref[j, k] for k in range(3)] for j in range(10)]
    b2 = [b2_ref[k] for k in range(3)]

    def chunk_body(c, carry):
        s0 = pl.multiple_of(c * chunk_s, chunk_s)
        sl = pl.ds(s0, chunk_s)
        x0 = x_ref[0, sl, :]                       # (chunk_s, 128) dense slab
        x1 = x_ref[1, sl, :]
        x2 = x_ref[2, sl, :]

        # Fused layers: h_j dies immediately into the 3 accumulators.
        acc0 = jnp.zeros_like(x0)
        acc1 = jnp.zeros_like(x0)
        acc2 = jnp.zeros_like(x0)
        for j in range(10):
            h = jnp.maximum(
                x0 * w1[0][j] + x1 * w1[1][j] + x2 * w1[2][j] + b1[j], 0.0)
            acc0 = acc0 + h * w2[j][0]
            acc1 = acc1 + h * w2[j][1]
            acc2 = acc2 + h * w2[j][2]

        o_ref[0, sl, :] = jnp.maximum(acc0 + b2[0], 0.0)
        o_ref[1, sl, :] = jnp.maximum(acc1 + b2[1], 0.0)
        o_ref[2, sl, :] = jnp.maximum(acc2 + b2[2], 0.0)
        return carry

    lax.fori_loop(0, n_chunks, chunk_body, 0, unroll=True)


def pidnet_forward(x, w1, b1, w2, b2, *, tile_s=1024):
    """x: (B, 3) f32 -> (B, 3) f32, y = relu(relu(x @ w1 + b1) @ w2 + b2).

    w1: (3, 10), b1: (10,), w2: (10, 3), b2: (3,)  (x @ W + b convention,
    i.e. transposes of the PyTorch nn.Linear weight matrices).
    """
    B = x.shape[0]

    # Map batch element b -> (sublane s, lane l) with b = s*128 + l.
    s_raw = pl.cdiv(B, LANE)
    chunk_s = CHUNK_S if s_raw >= CHUNK_S else SUBLANE
    s_min = pl.cdiv(s_raw, chunk_s) * chunk_s

    tile_s = max((min(tile_s, s_min) // chunk_s) * chunk_s, chunk_s)
    # v7x: keep >= 2 grid steps when there is enough work so both TensorCores
    # get a share of the "parallel" batch grid (no effect on v5e/v6e).
    if s_min > chunk_s:
        half = pl.cdiv(pl.cdiv(s_min, 2), chunk_s) * chunk_s
        tile_s = min(tile_s, half)

    s_pad = pl.cdiv(s_min, tile_s) * tile_s
    num_tiles = s_pad // tile_s
    b_pad = s_pad * LANE

    # Relayout (B, 3) -> feature-major (3, S, 128), padding only to b_pad.
    # TODO(synk): if the producer/consumer can use feature-major activations
    # directly, drop this transpose pair (largest remaining HBM cost).
    xt = jnp.zeros((b_pad, 3), jnp.float32).at[:B, :].set(x)
    xt = xt.reshape(s_pad, LANE, 3).transpose(2, 0, 1)

    out_t = pl.pallas_call(
        functools.partial(pidnet_kernel, chunk_s=chunk_s),
        out_shape=jax.ShapeDtypeStruct((3, s_pad, LANE), jnp.float32),
        grid=(num_tiles,),
        in_specs=[
            pl.BlockSpec(memory_space=pltpu.MemorySpace.SMEM),     # w1 (3,10)
            pl.BlockSpec(memory_space=pltpu.MemorySpace.SMEM),     # b1 (10,)
            pl.BlockSpec(memory_space=pltpu.MemorySpace.SMEM),     # w2 (10,3)
            pl.BlockSpec(memory_space=pltpu.MemorySpace.SMEM),     # b2 (3,)
            pl.BlockSpec((3, tile_s, LANE), lambda i: (0, i, 0)),  # x
        ],
        out_specs=pl.BlockSpec((3, tile_s, LANE), lambda i: (0, i, 0)),
        compiler_params=pltpu.CompilerParams(
            dimension_semantics=("parallel",)),
    )(w1, b1, w2, b2, xt)

    # Padded batch columns hold relu(bias) garbage; always slice before use.
    return out_t.transpose(1, 2, 0).reshape(b_pad, 3)[:B, :]


def init_params(key):
    # Deterministic init mimicking nn.Linear's uniform(-1/sqrt(fan_in), +...).
    k1, k2, k3, k4 = jax.random.split(key, 4)
    bound1 = 1.0 / jnp.sqrt(3.0)
    bound2 = 1.0 / jnp.sqrt(10.0)
    w1 = jax.random.uniform(k1, (3, 10), jnp.float32, -bound1, bound1)
    b1 = jax.random.uniform(k2, (10,), jnp.float32, -bound1, bound1)
    w2 = jax.random.uniform(k3, (10, 3), jnp.float32, -bound2, bound2)
    b2 = jax.random.uniform(k4, (3,), jnp.float32, -bound2, bound2)
    return w1, b1, w2, b2


if __name__ == "__main__":
    key = jax.random.PRNGKey(0)
    kx, kp = jax.random.split(key)

    batch = 8
    x = jax.random.normal(kx, (batch, 3), jnp.float32)
    w1, b1, w2, b2 = init_params(kp)

    out = pidnet_forward(x, w1, b1, w2, b2)
    jax.block_until_ready(out)

    # Pure-JAX reference check.
    ref = jnp.maximum(jnp.maximum(x @ w1 + b1, 0.0) @ w2 + b2, 0.0)
    assert out.shape == (batch, 3)
    assert jnp.allclose(out, ref, atol=1e-5, rtol=1e-5)

    print("KERNEL_OK")
</pallas_src>

<mosaic_0001>
module attributes {stable_mosaic.version = 11 : i64} {
  func.func @pidnet_kernel(%arg0: i32, %arg1: memref<3x10xf32, #tpu.memory_space<smem>>, %arg2: memref<10xf32, #tpu.memory_space<smem>>, %arg3: memref<10x3xf32, #tpu.memory_space<smem>>, %arg4: memref<3xf32, #tpu.memory_space<smem>>, %arg5: memref<3x8x128xf32, #tpu.memory_space<vmem>>, %arg6: memref<3x8x128xf32, #tpu.memory_space<vmem>>) attributes {dimension_semantics = [#tpu.dimension_semantics<parallel>], iteration_bounds = array<i64: 1>, scalar_prefetch = 0 : i64, scratch_operands = 0 : i64, tpu.core_type = #tpu.core_type<tc>, window_params = [{transform_indices = @transform_0, window_bounds = array<i64: 3, 10>}, {transform_indices = @transform_1, window_bounds = array<i64: 10>}, {transform_indices = @transform_2, window_bounds = array<i64: 10, 3>}, {transform_indices = @transform_3, window_bounds = array<i64: 3>}, {transform_indices = @transform_4, window_bounds = array<i64: 3, 8, 128>}, {transform_indices = @transform_5, window_bounds = array<i64: 3, 8, 128>}]} {
    %c0 = arith.constant 0 : index
    %c0_0 = arith.constant 0 : index
    %0 = memref.load %arg1[%c0, %c0_0] : memref<3x10xf32, #tpu.memory_space<smem>>
    %c0_1 = arith.constant 0 : index
    %c1 = arith.constant 1 : index
    %1 = memref.load %arg1[%c0_1, %c1] : memref<3x10xf32, #tpu.memory_space<smem>>
    %c0_2 = arith.constant 0 : index
    %c2 = arith.constant 2 : index
    %2 = memref.load %arg1[%c0_2, %c2] : memref<3x10xf32, #tpu.memory_space<smem>>
    %c0_3 = arith.constant 0 : index
    %c3 = arith.constant 3 : index
    %3 = memref.load %arg1[%c0_3, %c3] : memref<3x10xf32, #tpu.memory_space<smem>>
    %c0_4 = arith.constant 0 : index
    %c4 = arith.constant 4 : index
    %4 = memref.load %arg1[%c0_4, %c4] : memref<3x10xf32, #tpu.memory_space<smem>>
    %c0_5 = arith.constant 0 : index
    %c5 = arith.constant 5 : index
    %5 = memref.load %arg1[%c0_5, %c5] : memref<3x10xf32, #tpu.memory_space<smem>>
    %c0_6 = arith.constant 0 : index
    %c6 = arith.constant 6 : index
    %6 = memref.load %arg1[%c0_6, %c6] : memref<3x10xf32, #tpu.memory_space<smem>>
    %c0_7 = arith.constant 0 : index
    %c7 = arith.constant 7 : index
    %7 = memref.load %arg1[%c0_7, %c7] : memref<3x10xf32, #tpu.memory_space<smem>>
    %c0_8 = arith.constant 0 : index
    %c8 = arith.constant 8 : index
    %8 = memref.load %arg1[%c0_8, %c8] : memref<3x10xf32, #tpu.memory_space<smem>>
    %c0_9 = arith.constant 0 : index
    %c9 = arith.constant 9 : index
    %9 = memref.load %arg1[%c0_9, %c9] : memref<3x10xf32, #tpu.memory_space<smem>>
    %c1_10 = arith.constant 1 : index
    %c0_11 = arith.constant 0 : index
    %10 = memref.load %arg1[%c1_10, %c0_11] : memref<3x10xf32, #tpu.memory_space<smem>>
    %c1_12 = arith.constant 1 : index
    %c1_13 = arith.constant 1 : index
    %11 = memref.load %arg1[%c1_12, %c1_13] : memref<3x10xf32, #tpu.memory_space<smem>>
    %c1_14 = arith.constant 1 : index
    %c2_15 = arith.constant 2 : index
    %12 = memref.load %arg1[%c1_14, %c2_15] : memref<3x10xf32, #tpu.memory_space<smem>>
    %c1_16 = arith.constant 1 : index
    %c3_17 = arith.constant 3 : index
    %13 = memref.load %arg1[%c1_16, %c3_17] : memref<3x10xf32, #tpu.memory_space<smem>>
    %c1_18 = arith.constant 1 : index
    %c4_19 = arith.constant 4 : index
    %14 = memref.load %arg1[%c1_18, %c4_19] : memref<3x10xf32, #tpu.memory_space<smem>>
    %c1_20 = arith.constant 1 : index
    %c5_21 = arith.constant 5 : index
    %15 = memref.load %arg1[%c1_20, %c5_21] : memref<3x10xf32, #tpu.memory_space<smem>>
    %c1_22 = arith.constant 1 : index
    %c6_23 = arith.constant 6 : index
    %16 = memref.load %arg1[%c1_22, %c6_23] : memref<3x10xf32, #tpu.memory_space<smem>>
    %c1_24 = arith.constant 1 : index
    %c7_25 = arith.constant 7 : index
    %17 = memref.load %arg1[%c1_24, %c7_25] : memref<3x10xf32, #tpu.memory_space<smem>>
    %c1_26 = arith.constant 1 : index
    %c8_27 = arith.constant 8 : index
    %18 = memref.load %arg1[%c1_26, %c8_27] : memref<3x10xf32, #tpu.memory_space<smem>>
    %c1_28 = arith.constant 1 : index
    %c9_29 = arith.constant 9 : index
    %19 = memref.load %arg1[%c1_28, %c9_29] : memref<3x10xf32, #tpu.memory_space<smem>>
    %c2_30 = arith.constant 2 : index
    %c0_31 = arith.constant 0 : index
    %20 = memref.load %arg1[%c2_30, %c0_31] : memref<3x10xf32, #tpu.memory_space<smem>>
    %c2_32 = arith.constant 2 : index
    %c1_33 = arith.constant 1 : index
    %21 = memref.load %arg1[%c2_32, %c1_33] : memref<3x10xf32, #tpu.memory_space<smem>>
    %c2_34 = arith.constant 2 : index
    %c2_35 = arith.constant 2 : index
    %22 = memref.load %arg1[%c2_34, %c2_35] : memref<3x10xf32, #tpu.memory_space<smem>>
    %c2_36 = arith.constant 2 : index
    %c3_37 = arith.constant 3 : index
    %23 = memref.load %arg1[%c2_36, %c3_37] : memref<3x10xf32, #tpu.memory_space<smem>>
    %c2_38 = arith.constant 2 : index
    %c4_39 = arith.constant 4 : index
    %24 = memref.load %arg1[%c2_38, %c4_39] : memref<3x10xf32, #tpu.memory_space<smem>>
    %c2_40 = arith.constant 2 : index
    %c5_41 = arith.constant 5 : index
    %25 = memref.load %arg1[%c2_40, %c5_41] : memref<3x10xf32, #tpu.memory_space<smem>>
    %c2_42 = arith.constant 2 : index
    %c6_43 = arith.constant 6 : index
    %26 = memref.load %arg1[%c2_42, %c6_43] : memref<3x10xf32, #tpu.memory_space<smem>>
    %c2_44 = arith.constant 2 : index
    %c7_45 = arith.constant 7 : index
    %27 = memref.load %arg1[%c2_44, %c7_45] : memref<3x10xf32, #tpu.memory_space<smem>>
    %c2_46 = arith.constant 2 : index
    %c8_47 = arith.constant 8 : index
    %28 = memref.load %arg1[%c2_46, %c8_47] : memref<3x10xf32, #tpu.memory_space<smem>>
    %c2_48 = arith.constant 2 : index
    %c9_49 = arith.constant 9 : index
    %29 = memref.load %arg1[%c2_48, %c9_49] : memref<3x10xf32, #tpu.memory_space<smem>>
    %c0_50 = arith.constant 0 : index
    %30 = memref.load %arg2[%c0_50] : memref<10xf32, #tpu.memory_space<smem>>
    %c1_51 = arith.constant 1 : index
    %31 = memref.load %arg2[%c1_51] : memref<10xf32, #tpu.memory_space<smem>>
    %c2_52 = arith.constant 2 : index
    %32 = memref.load %arg2[%c2_52] : memref<10xf32, #tpu.memory_space<smem>>
    %c3_53 = arith.constant 3 : index
    %33 = memref.load %arg2[%c3_53] : memref<10xf32, #tpu.memory_space<smem>>
    %c4_54 = arith.constant 4 : index
    %34 = memref.load %arg2[%c4_54] : memref<10xf32, #tpu.memory_space<smem>>
    %c5_55 = arith.constant 5 : index
    %35 = memref.load %arg2[%c5_55] : memref<10xf32, #tpu.memory_space<smem>>
    %c6_56 = arith.constant 6 : index
    %36 = memref.load %arg2[%c6_56] : memref<10xf32, #tpu.memory_space<smem>>
    %c7_57 = arith.constant 7 : index
    %37 = memref.load %arg2[%c7_57] : memref<10xf32, #tpu.memory_space<smem>>
    %c8_58 = arith.constant 8 : index
    %38 = memref.load %arg2[%c8_58] : memref<10xf32, #tpu.memory_space<smem>>
    %c9_59 = arith.constant 9 : index
    %39 = memref.load %arg2[%c9_59] : memref<10xf32, #tpu.memory_space<smem>>
    %c0_60 = arith.constant 0 : index
    %c0_61 = arith.constant 0 : index
    %40 = memref.load %arg3[%c0_60, %c0_61] : memref<10x3xf32, #tpu.memory_space<smem>>
    %c0_62 = arith.constant 0 : index
    %c1_63 = arith.constant 1 : index
    %41 = memref.load %arg3[%c0_62, %c1_63] : memref<10x3xf32, #tpu.memory_space<smem>>
    %c0_64 = arith.constant 0 : index
    %c2_65 = arith.constant 2 : index
    %42 = memref.load %arg3[%c0_64, %c2_65] : memref<10x3xf32, #tpu.memory_space<smem>>
    %c1_66 = arith.constant 1 : index
    %c0_67 = arith.constant 0 : index
    %43 = memref.load %arg3[%c1_66, %c0_67] : memref<10x3xf32, #tpu.memory_space<smem>>
    %c1_68 = arith.constant 1 : index
    %c1_69 = arith.constant 1 : index
    %44 = memref.load %arg3[%c1_68, %c1_69] : memref<10x3xf32, #tpu.memory_space<smem>>
    %c1_70 = arith.constant 1 : index
    %c2_71 = arith.constant 2 : index
    %45 = memref.load %arg3[%c1_70, %c2_71] : memref<10x3xf32, #tpu.memory_space<smem>>
    %c2_72 = arith.constant 2 : index
    %c0_73 = arith.constant 0 : index
    %46 = memref.load %arg3[%c2_72, %c0_73] : memref<10x3xf32, #tpu.memory_space<smem>>
    %c2_74 = arith.constant 2 : index
    %c1_75 = arith.constant 1 : index
    %47 = memref.load %arg3[%c2_74, %c1_75] : memref<10x3xf32, #tpu.memory_space<smem>>
    %c2_76 = arith.constant 2 : index
    %c2_77 = arith.constant 2 : index
    %48 = memref.load %arg3[%c2_76, %c2_77] : memref<10x3xf32, #tpu.memory_space<smem>>
    %c3_78 = arith.constant 3 : index
    %c0_79 = arith.constant 0 : index
    %49 = memref.load %arg3[%c3_78, %c0_79] : memref<10x3xf32, #tpu.memory_space<smem>>
    %c3_80 = arith.constant 3 : index
    %c1_81 = arith.constant 1 : index
    %50 = memref.load %arg3[%c3_80, %c1_81] : memref<10x3xf32, #tpu.memory_space<smem>>
    %c3_82 = arith.constant 3 : index
    %c2_83 = arith.constant 2 : index
    %51 = memref.load %arg3[%c3_82, %c2_83] : memref<10x3xf32, #tpu.memory_space<smem>>
    %c4_84 = arith.constant 4 : index
    %c0_85 = arith.constant 0 : index
    %52 = memref.load %arg3[%c4_84, %c0_85] : memref<10x3xf32, #tpu.memory_space<smem>>
    %c4_86 = arith.constant 4 : index
    %c1_87 = arith.constant 1 : index
    %53 = memref.load %arg3[%c4_86, %c1_87] : memref<10x3xf32, #tpu.memory_space<smem>>
    %c4_88 = arith.constant 4 : index
    %c2_89 = arith.constant 2 : index
    %54 = memref.load %arg3[%c4_88, %c2_89] : memref<10x3xf32, #tpu.memory_space<smem>>
    %c5_90 = arith.constant 5 : index
    %c0_91 = arith.constant 0 : index
    %55 = memref.load %arg3[%c5_90, %c0_91] : memref<10x3xf32, #tpu.memory_space<smem>>
    %c5_92 = arith.constant 5 : index
    %c1_93 = arith.constant 1 : index
    %56 = memref.load %arg3[%c5_92, %c1_93] : memref<10x3xf32, #tpu.memory_space<smem>>
    %c5_94 = arith.constant 5 : index
    %c2_95 = arith.constant 2 : index
    %57 = memref.load %arg3[%c5_94, %c2_95] : memref<10x3xf32, #tpu.memory_space<smem>>
    %c6_96 = arith.constant 6 : index
    %c0_97 = arith.constant 0 : index
    %58 = memref.load %arg3[%c6_96, %c0_97] : memref<10x3xf32, #tpu.memory_space<smem>>
    %c6_98 = arith.constant 6 : index
    %c1_99 = arith.constant 1 : index
    %59 = memref.load %arg3[%c6_98, %c1_99] : memref<10x3xf32, #tpu.memory_space<smem>>
    %c6_100 = arith.constant 6 : index
    %c2_101 = arith.constant 2 : index
    %60 = memref.load %arg3[%c6_100, %c2_101] : memref<10x3xf32, #tpu.memory_space<smem>>
    %c7_102 = arith.constant 7 : index
    %c0_103 = arith.constant 0 : index
    %61 = memref.load %arg3[%c7_102, %c0_103] : memref<10x3xf32, #tpu.memory_space<smem>>
    %c7_104 = arith.constant 7 : index
    %c1_105 = arith.constant 1 : index
    %62 = memref.load %arg3[%c7_104, %c1_105] : memref<10x3xf32, #tpu.memory_space<smem>>
    %c7_106 = arith.constant 7 : index
    %c2_107 = arith.constant 2 : index
    %63 = memref.load %arg3[%c7_106, %c2_107] : memref<10x3xf32, #tpu.memory_space<smem>>
    %c8_108 = arith.constant 8 : index
    %c0_109 = arith.constant 0 : index
    %64 = memref.load %arg3[%c8_108, %c0_109] : memref<10x3xf32, #tpu.memory_space<smem>>
    %c8_110 = arith.constant 8 : index
    %c1_111 = arith.constant 1 : index
    %65 = memref.load %arg3[%c8_110, %c1_111] : memref<10x3xf32, #tpu.memory_space<smem>>
    %c8_112 = arith.constant 8 : index
    %c2_113 = arith.constant 2 : index
    %66 = memref.load %arg3[%c8_112, %c2_113] : memref<10x3xf32, #tpu.memory_space<smem>>
    %c9_114 = arith.constant 9 : index
    %c0_115 = arith.constant 0 : index
    %67 = memref.load %arg3[%c9_114, %c0_115] : memref<10x3xf32, #tpu.memory_space<smem>>
    %c9_116 = arith.constant 9 : index
    %c1_117 = arith.constant 1 : index
    %68 = memref.load %arg3[%c9_116, %c1_117] : memref<10x3xf32, #tpu.memory_space<smem>>
    %c9_118 = arith.constant 9 : index
    %c2_119 = arith.constant 2 : index
    %69 = memref.load %arg3[%c9_118, %c2_119] : memref<10x3xf32, #tpu.memory_space<smem>>
    %c0_120 = arith.constant 0 : index
    %70 = memref.load %arg4[%c0_120] : memref<3xf32, #tpu.memory_space<smem>>
    %c1_121 = arith.constant 1 : index
    %71 = memref.load %arg4[%c1_121] : memref<3xf32, #tpu.memory_space<smem>>
    %c2_122 = arith.constant 2 : index
    %72 = memref.load %arg4[%c2_122] : memref<3xf32, #tpu.memory_space<smem>>
    %c0_i32 = arith.constant 0 : i32
    %c8_i32 = arith.constant 8 : i32
    %73 = arith.muli %c0_i32, %c8_i32 : i32
    %74 = tpu.assume_multiple %73, 8 : i32
    %c0_123 = arith.constant 0 : index
    %75 = arith.index_cast %74 : i32 to index
    %c0_124 = arith.constant 0 : index
    %76 = vector.load %arg5[%c0_123, %75, %c0_124] : memref<3x8x128xf32, #tpu.memory_space<vmem>>, vector<1x8x128xf32>
    %77 = vector.shape_cast %76 : vector<1x8x128xf32> to vector<8x128xf32>
    %c1_125 = arith.constant 1 : index
    %78 = arith.index_cast %74 : i32 to index
    %c0_126 = arith.constant 0 : index
    %79 = vector.load %arg5[%c1_125, %78, %c0_126] : memref<3x8x128xf32, #tpu.memory_space<vmem>>, vector<1x8x128xf32>
    %80 = vector.shape_cast %79 : vector<1x8x128xf32> to vector<8x128xf32>
    %c2_127 = arith.constant 2 : index
    %81 = arith.index_cast %74 : i32 to index
    %c0_128 = arith.constant 0 : index
    %82 = vector.load %arg5[%c2_127, %81, %c0_128] : memref<3x8x128xf32, #tpu.memory_space<vmem>>, vector<1x8x128xf32>
    %83 = vector.shape_cast %82 : vector<1x8x128xf32> to vector<8x128xf32>
    %cst = arith.constant 0.000000e+00 : f32
    %84 = vector.broadcast %cst : f32 to vector<8x128xf32>
    %cst_129 = arith.constant 0.000000e+00 : f32
    %85 = vector.broadcast %cst_129 : f32 to vector<8x128xf32>
    %cst_130 = arith.constant 0.000000e+00 : f32
    %86 = vector.broadcast %cst_130 : f32 to vector<8x128xf32>
    %87 = vector.broadcast %0 : f32 to vector<8x128xf32>
    %88 = arith.mulf %77, %87 : vector<8x128xf32>
    %89 = vector.broadcast %10 : f32 to vector<8x128xf32>
    %90 = arith.mulf %80, %89 : vector<8x128xf32>
    %91 = arith.addf %88, %90 : vector<8x128xf32>
    %92 = vector.broadcast %20 : f32 to vector<8x128xf32>
    %93 = arith.mulf %83, %92 : vector<8x128xf32>
    %94 = arith.addf %91, %93 : vector<8x128xf32>
    %95 = vector.broadcast %30 : f32 to vector<8x128xf32>
    %96 = arith.addf %94, %95 : vector<8x128xf32>
    %cst_131 = arith.constant 0.000000e+00 : f32
    %97 = vector.broadcast %cst_131 : f32 to vector<8x128xf32>
    %98 = arith.maximumf %96, %97 : vector<8x128xf32>
    %99 = vector.broadcast %40 : f32 to vector<8x128xf32>
    %100 = arith.mulf %98, %99 : vector<8x128xf32>
    %101 = arith.addf %84, %100 : vector<8x128xf32>
    %102 = vector.broadcast %41 : f32 to vector<8x128xf32>
    %103 = arith.mulf %98, %102 : vector<8x128xf32>
    %104 = arith.addf %85, %103 : vector<8x128xf32>
    %105 = vector.broadcast %42 : f32 to vector<8x128xf32>
    %106 = arith.mulf %98, %105 : vector<8x128xf32>
    %107 = arith.addf %86, %106 : vector<8x128xf32>
    %108 = vector.broadcast %1 : f32 to vector<8x128xf32>
    %109 = arith.mulf %77, %108 : vector<8x128xf32>
    %110 = vector.broadcast %11 : f32 to vector<8x128xf32>
    %111 = arith.mulf %80, %110 : vector<8x128xf32>
    %112 = arith.addf %109, %111 : vector<8x128xf32>
    %113 = vector.broadcast %21 : f32 to vector<8x128xf32>
    %114 = arith.mulf %83, %113 : vector<8x128xf32>
    %115 = arith.addf %112, %114 : vector<8x128xf32>
    %116 = vector.broadcast %31 : f32 to vector<8x128xf32>
    %117 = arith.addf %115, %116 : vector<8x128xf32>
    %cst_132 = arith.constant 0.000000e+00 : f32
    %118 = vector.broadcast %cst_132 : f32 to vector<8x128xf32>
    %119 = arith.maximumf %117, %118 : vector<8x128xf32>
    %120 = vector.broadcast %43 : f32 to vector<8x128xf32>
    %121 = arith.mulf %119, %120 : vector<8x128xf32>
    %122 = arith.addf %101, %121 : vector<8x128xf32>
    %123 = vector.broadcast %44 : f32 to vector<8x128xf32>
    %124 = arith.mulf %119, %123 : vector<8x128xf32>
    %125 = arith.addf %104, %124 : vector<8x128xf32>
    %126 = vector.broadcast %45 : f32 to vector<8x128xf32>
    %127 = arith.mulf %119, %126 : vector<8x128xf32>
    %128 = arith.addf %107, %127 : vector<8x128xf32>
    %129 = vector.broadcast %2 : f32 to vector<8x128xf32>
    %130 = arith.mulf %77, %129 : vector<8x128xf32>
    %131 = vector.broadcast %12 : f32 to vector<8x128xf32>
    %132 = arith.mulf %80, %131 : vector<8x128xf32>
    %133 = arith.addf %130, %132 : vector<8x128xf32>
    %134 = vector.broadcast %22 : f32 to vector<8x128xf32>
    %135 = arith.mulf %83, %134 : vector<8x128xf32>
    %136 = arith.addf %133, %135 : vector<8x128xf32>
    %137 = vector.broadcast %32 : f32 to vector<8x128xf32>
    %138 = arith.addf %136, %137 : vector<8x128xf32>
    %cst_133 = arith.constant 0.000000e+00 : f32
    %139 = vector.broadcast %cst_133 : f32 to vector<8x128xf32>
    %140 = arith.maximumf %138, %139 : vector<8x128xf32>
    %141 = vector.broadcast %46 : f32 to vector<8x128xf32>
    %142 = arith.mulf %140, %141 : vector<8x128xf32>
    %143 = arith.addf %122, %142 : vector<8x128xf32>
    %144 = vector.broadcast %47 : f32 to vector<8x128xf32>
    %145 = arith.mulf %140, %144 : vector<8x128xf32>
    %146 = arith.addf %125, %145 : vector<8x128xf32>
    %147 = vector.broadcast %48 : f32 to vector<8x128xf32>
    %148 = arith.mulf %140, %147 : vector<8x128xf32>
    %149 = arith.addf %128, %148 : vector<8x128xf32>
    %150 = vector.broadcast %3 : f32 to vector<8x128xf32>
    %151 = arith.mulf %77, %150 : vector<8x128xf32>
    %152 = vector.broadcast %13 : f32 to vector<8x128xf32>
    %153 = arith.mulf %80, %152 : vector<8x128xf32>
    %154 = arith.addf %151, %153 : vector<8x128xf32>
    %155 = vector.broadcast %23 : f32 to vector<8x128xf32>
    %156 = arith.mulf %83, %155 : vector<8x128xf32>
    %157 = arith.addf %154, %156 : vector<8x128xf32>
    %158 = vector.broadcast %33 : f32 to vector<8x128xf32>
    %159 = arith.addf %157, %158 : vector<8x128xf32>
    %cst_134 = arith.constant 0.000000e+00 : f32
    %160 = vector.broadcast %cst_134 : f32 to vector<8x128xf32>
    %161 = arith.maximumf %159, %160 : vector<8x128xf32>
    %162 = vector.broadcast %49 : f32 to vector<8x128xf32>
    %163 = arith.mulf %161, %162 : vector<8x128xf32>
    %164 = arith.addf %143, %163 : vector<8x128xf32>
    %165 = vector.broadcast %50 : f32 to vector<8x128xf32>
    %166 = arith.mulf %161, %165 : vector<8x128xf32>
    %167 = arith.addf %146, %166 : vector<8x128xf32>
    %168 = vector.broadcast %51 : f32 to vector<8x128xf32>
    %169 = arith.mulf %161, %168 : vector<8x128xf32>
    %170 = arith.addf %149, %169 : vector<8x128xf32>
    %171 = vector.broadcast %4 : f32 to vector<8x128xf32>
    %172 = arith.mulf %77, %171 : vector<8x128xf32>
    %173 = vector.broadcast %14 : f32 to vector<8x128xf32>
    %174 = arith.mulf %80, %173 : vector<8x128xf32>
    %175 = arith.addf %172, %174 : vector<8x128xf32>
    %176 = vector.broadcast %24 : f32 to vector<8x128xf32>
    %177 = arith.mulf %83, %176 : vector<8x128xf32>
    %178 = arith.addf %175, %177 : vector<8x128xf32>
    %179 = vector.broadcast %34 : f32 to vector<8x128xf32>
    %180 = arith.addf %178, %179 : vector<8x128xf32>
    %cst_135 = arith.constant 0.000000e+00 : f32
    %181 = vector.broadcast %cst_135 : f32 to vector<8x128xf32>
    %182 = arith.maximumf %180, %181 : vector<8x128xf32>
    %183 = vector.broadcast %52 : f32 to vector<8x128xf32>
    %184 = arith.mulf %182, %183 : vector<8x128xf32>
    %185 = arith.addf %164, %184 : vector<8x128xf32>
    %186 = vector.broadcast %53 : f32 to vector<8x128xf32>
    %187 = arith.mulf %182, %186 : vector<8x128xf32>
    %188 = arith.addf %167, %187 : vector<8x128xf32>
    %189 = vector.broadcast %54 : f32 to vector<8x128xf32>
    %190 = arith.mulf %182, %189 : vector<8x128xf32>
    %191 = arith.addf %170, %190 : vector<8x128xf32>
    %192 = vector.broadcast %5 : f32 to vector<8x128xf32>
    %193 = arith.mulf %77, %192 : vector<8x128xf32>
    %194 = vector.broadcast %15 : f32 to vector<8x128xf32>
    %195 = arith.mulf %80, %194 : vector<8x128xf32>
    %196 = arith.addf %193, %195 : vector<8x128xf32>
    %197 = vector.broadcast %25 : f32 to vector<8x128xf32>
    %198 = arith.mulf %83, %197 : vector<8x128xf32>
    %199 = arith.addf %196, %198 : vector<8x128xf32>
    %200 = vector.broadcast %35 : f32 to vector<8x128xf32>
    %201 = arith.addf %199, %200 : vector<8x128xf32>
    %cst_136 = arith.constant 0.000000e+00 : f32
    %202 = vector.broadcast %cst_136 : f32 to vector<8x128xf32>
    %203 = arith.maximumf %201, %202 : vector<8x128xf32>
    %204 = vector.broadcast %55 : f32 to vector<8x128xf32>
    %205 = arith.mulf %203, %204 : vector<8x128xf32>
    %206 = arith.addf %185, %205 : vector<8x128xf32>
    %207 = vector.broadcast %56 : f32 to vector<8x128xf32>
    %208 = arith.mulf %203, %207 : vector<8x128xf32>
    %209 = arith.addf %188, %208 : vector<8x128xf32>
    %210 = vector.broadcast %57 : f32 to vector<8x128xf32>
    %211 = arith.mulf %203, %210 : vector<8x128xf32>
    %212 = arith.addf %191, %211 : vector<8x128xf32>
    %213 = vector.broadcast %6 : f32 to vector<8x128xf32>
    %214 = arith.mulf %77, %213 : vector<8x128xf32>
    %215 = vector.broadcast %16 : f32 to vector<8x128xf32>
    %216 = arith.mulf %80, %215 : vector<8x128xf32>
    %217 = arith.addf %214, %216 : vector<8x128xf32>
    %218 = vector.broadcast %26 : f32 to vector<8x128xf32>
    %219 = arith.mulf %83, %218 : vector<8x128xf32>
    %220 = arith.addf %217, %219 : vector<8x128xf32>
    %221 = vector.broadcast %36 : f32 to vector<8x128xf32>
    %222 = arith.addf %220, %221 : vector<8x128xf32>
    %cst_137 = arith.constant 0.000000e+00 : f32
    %223 = vector.broadcast %cst_137 : f32 to vector<8x128xf32>
    %224 = arith.maximumf %222, %223 : vector<8x128xf32>
    %225 = vector.broadcast %58 : f32 to vector<8x128xf32>
    %226 = arith.mulf %224, %225 : vector<8x128xf32>
    %227 = arith.addf %206, %226 : vector<8x128xf32>
    %228 = vector.broadcast %59 : f32 to vector<8x128xf32>
    %229 = arith.mulf %224, %228 : vector<8x128xf32>
    %230 = arith.addf %209, %229 : vector<8x128xf32>
    %231 = vector.broadcast %60 : f32 to vector<8x128xf32>
    %232 = arith.mulf %224, %231 : vector<8x128xf32>
    %233 = arith.addf %212, %232 : vector<8x128xf32>
    %234 = vector.broadcast %7 : f32 to vector<8x128xf32>
    %235 = arith.mulf %77, %234 : vector<8x128xf32>
    %236 = vector.broadcast %17 : f32 to vector<8x128xf32>
    %237 = arith.mulf %80, %236 : vector<8x128xf32>
    %238 = arith.addf %235, %237 : vector<8x128xf32>
    %239 = vector.broadcast %27 : f32 to vector<8x128xf32>
    %240 = arith.mulf %83, %239 : vector<8x128xf32>
    %241 = arith.addf %238, %240 : vector<8x128xf32>
    %242 = vector.broadcast %37 : f32 to vector<8x128xf32>
    %243 = arith.addf %241, %242 : vector<8x128xf32>
    %cst_138 = arith.constant 0.000000e+00 : f32
    %244 = vector.broadcast %cst_138 : f32 to vector<8x128xf32>
    %245 = arith.maximumf %243, %244 : vector<8x128xf32>
    %246 = vector.broadcast %61 : f32 to vector<8x128xf32>
    %247 = arith.mulf %245, %246 : vector<8x128xf32>
    %248 = arith.addf %227, %247 : vector<8x128xf32>
    %249 = vector.broadcast %62 : f32 to vector<8x128xf32>
    %250 = arith.mulf %245, %249 : vector<8x128xf32>
    %251 = arith.addf %230, %250 : vector<8x128xf32>
    %252 = vector.broadcast %63 : f32 to vector<8x128xf32>
    %253 = arith.mulf %245, %252 : vector<8x128xf32>
    %254 = arith.addf %233, %253 : vector<8x128xf32>
    %255 = vector.broadcast %8 : f32 to vector<8x128xf32>
    %256 = arith.mulf %77, %255 : vector<8x128xf32>
    %257 = vector.broadcast %18 : f32 to vector<8x128xf32>
    %258 = arith.mulf %80, %257 : vector<8x128xf32>
    %259 = arith.addf %256, %258 : vector<8x128xf32>
    %260 = vector.broadcast %28 : f32 to vector<8x128xf32>
    %261 = arith.mulf %83, %260 : vector<8x128xf32>
    %262 = arith.addf %259, %261 : vector<8x128xf32>
    %263 = vector.broadcast %38 : f32 to vector<8x128xf32>
    %264 = arith.addf %262, %263 : vector<8x128xf32>
    %cst_139 = arith.constant 0.000000e+00 : f32
    %265 = vector.broadcast %cst_139 : f32 to vector<8x128xf32>
    %266 = arith.maximumf %264, %265 : vector<8x128xf32>
    %267 = vector.broadcast %64 : f32 to vector<8x128xf32>
    %268 = arith.mulf %266, %267 : vector<8x128xf32>
    %269 = arith.addf %248, %268 : vector<8x128xf32>
    %270 = vector.broadcast %65 : f32 to vector<8x128xf32>
    %271 = arith.mulf %266, %270 : vector<8x128xf32>
    %272 = arith.addf %251, %271 : vector<8x128xf32>
    %273 = vector.broadcast %66 : f32 to vector<8x128xf32>
    %274 = arith.mulf %266, %273 : vector<8x128xf32>
    %275 = arith.addf %254, %274 : vector<8x128xf32>
    %276 = vector.broadcast %9 : f32 to vector<8x128xf32>
    %277 = arith.mulf %77, %276 : vector<8x128xf32>
    %278 = vector.broadcast %19 : f32 to vector<8x128xf32>
    %279 = arith.mulf %80, %278 : vector<8x128xf32>
    %280 = arith.addf %277, %279 : vector<8x128xf32>
    %281 = vector.broadcast %29 : f32 to vector<8x128xf32>
    %282 = arith.mulf %83, %281 : vector<8x128xf32>
    %283 = arith.addf %280, %282 : vector<8x128xf32>
    %284 = vector.broadcast %39 : f32 to vector<8x128xf32>
    %285 = arith.addf %283, %284 : vector<8x128xf32>
    %cst_140 = arith.constant 0.000000e+00 : f32
    %286 = vector.broadcast %cst_140 : f32 to vector<8x128xf32>
    %287 = arith.maximumf %285, %286 : vector<8x128xf32>
    %288 = vector.broadcast %67 : f32 to vector<8x128xf32>
    %289 = arith.mulf %287, %288 : vector<8x128xf32>
    %290 = arith.addf %269, %289 : vector<8x128xf32>
    %291 = vector.broadcast %68 : f32 to vector<8x128xf32>
    %292 = arith.mulf %287, %291 : vector<8x128xf32>
    %293 = arith.addf %272, %292 : vector<8x128xf32>
    %294 = vector.broadcast %69 : f32 to vector<8x128xf32>
    %295 = arith.mulf %287, %294 : vector<8x128xf32>
    %296 = arith.addf %275, %295 : vector<8x128xf32>
    %297 = vector.broadcast %70 : f32 to vector<8x128xf32>
    %298 = arith.addf %290, %297 : vector<8x128xf32>
    %cst_141 = arith.constant 0.000000e+00 : f32
    %299 = vector.broadcast %cst_141 : f32 to vector<8x128xf32>
    %300 = arith.maximumf %298, %299 : vector<8x128xf32>
    %c0_142 = arith.constant 0 : index
    %301 = arith.index_cast %74 : i32 to index
    %c0_143 = arith.constant 0 : index
    %302 = vector.load %arg6[%c0_142, %301, %c0_143] : memref<3x8x128xf32, #tpu.memory_space<vmem>>, vector<1x8x128xf32>
    %303 = vector.shape_cast %302 : vector<1x8x128xf32> to vector<8x128xf32>
    %304 = vector.shape_cast %300 : vector<8x128xf32> to vector<1x8x128xf32>
    tpu.vector_store %arg6[%c0_142, %301, %c0_143], %304 {strides = array<i32>} : memref<3x8x128xf32, #tpu.memory_space<vmem>>, vector<1x8x128xf32>,
    %305 = vector.broadcast %71 : f32 to vector<8x128xf32>
    %306 = arith.addf %293, %305 : vector<8x128xf32>
    %cst_144 = arith.constant 0.000000e+00 : f32
    %307 = vector.broadcast %cst_144 : f32 to vector<8x128xf32>
    %308 = arith.maximumf %306, %307 : vector<8x128xf32>
    %c1_145 = arith.constant 1 : index
    %309 = arith.index_cast %74 : i32 to index
    %c0_146 = arith.constant 0 : index
    %310 = vector.load %arg6[%c1_145, %309, %c0_146] : memref<3x8x128xf32, #tpu.memory_space<vmem>>, vector<1x8x128xf32>
    %311 = vector.shape_cast %310 : vector<1x8x128xf32> to vector<8x128xf32>
    %312 = vector.shape_cast %308 : vector<8x128xf32> to vector<1x8x128xf32>
    tpu.vector_store %arg6[%c1_145, %309, %c0_146], %312 {strides = array<i32>} : memref<3x8x128xf32, #tpu.memory_space<vmem>>, vector<1x8x128xf32>,
    %313 = vector.broadcast %72 : f32 to vector<8x128xf32>
    %314 = arith.addf %296, %313 : vector<8x128xf32>
    %cst_147 = arith.constant 0.000000e+00 : f32
    %315 = vector.broadcast %cst_147 : f32 to vector<8x128xf32>
    %316 = arith.maximumf %314, %315 : vector<8x128xf32>
    %c2_148 = arith.constant 2 : index
    %317 = arith.index_cast %74 : i32 to index
    %c0_149 = arith.constant 0 : index
    %318 = vector.load %arg6[%c2_148, %317, %c0_149] : memref<3x8x128xf32, #tpu.memory_space<vmem>>, vector<1x8x128xf32>
    %319 = vector.shape_cast %318 : vector<1x8x128xf32> to vector<8x128xf32>
    %320 = vector.shape_cast %316 : vector<8x128xf32> to vector<1x8x128xf32>
    tpu.vector_store %arg6[%c2_148, %317, %c0_149], %320 {strides = array<i32>} : memref<3x8x128xf32, #tpu.memory_space<vmem>>, vector<1x8x128xf32>,
    %c1_i32 = arith.constant 1 : i32
    return
  }
  func.func @transform_0(%arg0: i32) -> (i32, i32) {
    %c0_i32 = arith.constant 0 : i32
    %c0_i32_0 = arith.constant 0 : i32
    %c0_i32_1 = arith.constant 0 : i32
    return %c0_i32, %c0_i32_0 : i32, i32
  }
  func.func @transform_1(%arg0: i32) -> i32 {
    %c0_i32 = arith.constant 0 : i32
    %c0_i32_0 = arith.constant 0 : i32
    return %c0_i32 : i32
  }
  func.func @transform_2(%arg0: i32) -> (i32, i32) {
    %c0_i32 = arith.constant 0 : i32
    %c0_i32_0 = arith.constant 0 : i32
    %c0_i32_1 = arith.constant 0 : i32
    return %c0_i32, %c0_i32_0 : i32, i32
  }
  func.func @transform_3(%arg0: i32) -> i32 {
    %c0_i32 = arith.constant 0 : i32
    %c0_i32_0 = arith.constant 0 : i32
    return %c0_i32 : i32
  }
  func.func @transform_4(%arg0: i32) -> (i32, i32, i32) {
    %c0_i32 = arith.constant 0 : i32
    %c0_i32_0 = arith.constant 0 : i32
    %c0_i32_1 = arith.constant 0 : i32
    return %c0_i32, %arg0, %c0_i32_0 : i32, i32, i32
  }
  func.func @transform_5(%arg0: i32) -> (i32, i32, i32) {
    %c0_i32 = arith.constant 0 : i32
    %c0_i32_0 = arith.constant 0 : i32
    %c0_i32_1 = arith.constant 0 : i32
    return %c0_i32, %arg0, %c0_i32_0 : i32, i32, i32
  }
}

</mosaic_0001>

<bundles_post_ra>
// kernel: tpu_custom_call.1
= control target key start
LH: loop header
LB: loop body
LE: loop exit
PB: predicated region body
PF: predicated region fallthrough
CT: control target
= control target key end

     0   :  { %s837_s0 = inlined_call_operand.hbm [shape: f32[3,10], index: 0, kind: input, shape index: {}]   ;;  %s838_s1 = inlined_call_operand.vmem [shape: f32[10], index: 1, kind: input, shape index: {}]   ;;  %s839_s2 = inlined_call_operand.vmem [shape: f32[10,3], index: 2, kind: input, shape index: {}]   ;;  %s840_s3 = inlined_call_operand.vmem [shape: f32[3], index: 3, kind: input, shape index: {}]   ;;  %s841_s4 = inlined_call_operand.vmem [shape: f32[3,8,128], index: 4, kind: input, shape index: {}]   ;;  %s842_s5 = inlined_call_operand.hbm [shape: f32[3,8,128], index: 5, kind: output, shape index: {}]  }
   0x1   :  { %845 = sst [smem:[#allocation16_spill]] %s842_s5 }
   0x2   :  { %10 = vsyncpa [#allocation4], 0 }
   0x3   :  { %11 = vsyncpa [#allocation5], 0 }
   0x4   :  { %12 = vsyncpa [#allocation8], 0  ;;  %s37_s20 = sshll.u32 %s839_s2, 4  ;;  %s38_s20 = int_to_ptr.vmem [resolvable:$true] %s37_s20 }
   0x5   :  { %13 = vsyncpa [#allocation3], 0  ;;  %s464_s21 = scalar_lea.vmem %s38_s20, 256  ;;  %p469_p1 = scmp.lt.s32.totalorder %s38_s20, %s38_s20 }
   0x6   :  { %p465_p0 = scmp.ne.s32.totalorder %s38_s20, %s464_s21  ;;  %p470_p2 = scmp.lt.s32.totalorder %s464_s21, %s464_s21 }
   0x8   :  { %p471_p3 = por %p470_p2, %p469_p1 }
   0xa   :  { %p472_p4 = pnand %p471_p3, %p465_p0 }
   0xc   :  { %475 = shalt.err (!%p472_p4)
}
   0xd   :  { %s536_s22 = smov [#allocation7]   ;;  %s843_s23 = smov 128  }
   0xe   :  { %s844_s24 = smov 8   ;;  %s539_s25 = smov [#allocation2]  }
   0xf   :  { %43 = dma.vmem_to_smem %s38_s20, 256, %s536_s22, [#allocation8], %s843_s23, %s843_s23, %s844_s24  }
  0x10   :  { %21 = dma.hbm_to_smem %s837_s0, 64, %s539_s25, [#allocation4]  }
  0x11   :  { %s28_s29 = sshll.u32 %s838_s1, 4  ;;  %s50_s7 = sshll.u32 %s840_s3, 4  ;;  %s29_s29 = int_to_ptr.vmem [resolvable:$true] %s28_s29  ;;  %s51_s7 = int_to_ptr.vmem [resolvable:$true] %s50_s7 }
  0x12   :  { %s484_s8 = scalar_lea.vmem %s29_s29, 16  ;;  %p489_p6 = scmp.lt.s32.totalorder %s29_s29, %s29_s29 }
  0x13   :  { %p485_p5 = scmp.ne.s32.totalorder %s29_s29, %s484_s8  ;;  %p490_p7 = scmp.lt.s32.totalorder %s484_s8, %s484_s8 }
  0x15   :  { %p491_p8 = por %p490_p7, %p489_p6 }
  0x17   :  { %p492_p9 = pnand %p491_p8, %p485_p5 }
  0x19   :  { %495 = shalt.err (!%p492_p9)
}
  0x1a   :  { %s540_s9 = smov [#allocation6]   ;;  %s496_s0 = scalar_lea.vmem %s51_s7, 16 }
  0x1b   :  { %31 = dma.vmem_to_smem %s29_s29, 16, %s540_s9, [#allocation5]  }
  0x1c   :  { %p497_p10 = scmp.ne.s32.totalorder %s51_s7, %s496_s0  ;;  %p501_p11 = scmp.lt.s32.totalorder %s51_s7, %s51_s7 }
  0x1d   :  { %p502_p12 = scmp.lt.s32.totalorder %s496_s0, %s496_s0 }
  0x1f   :  { %p503_p13 = por %p502_p12, %p501_p11 }
  0x21   :  { %p504_p0 = pnand %p503_p13, %p497_p10 }
  0x23   :  { %507 = shalt.err (!%p504_p0)
}
  0x24   :  { %s541_s1 = smov [#allocation9]  }
  0x25   :  { %53 = dma.vmem_to_smem %s51_s7, 16, %s541_s1, [#allocation8]  }
  0x26   :  { %528 = dma.done.wait [#allocation4], 64  }
  0x27   :  { %529 = vsyncadd [#allocation4], 4294967232 }
  0x28   :  { %530 = dma.done.wait [#allocation5], 16  }
  0x29   :  { %531 = vsyncadd [#allocation5], 4294967280 }
  0x2a   :  { %532 = dma.done.wait [#allocation8], 272  }
  0x2b   :  { %533 = vsyncadd [#allocation8], 4294967024 }
  0x2c   :  { %68 = sfence }
  0x2d   :  { %s588_s3 = sld [smem:[#allocation2]]  ;;  %v142_v0 = vld [vmem:[%s841_s4] sm:$0xff]  ;;  %v648_v3 = vld [vmem:[%s841_s4 + $0x8] sm:$0xff]  ;;  %v669_v16 = vld [vmem:[%s841_s4 + $0x10] sm:$0xff] }
  0x2e   :  { %s590_s10 = sld [smem:[#allocation2 + $0x1]] }
  0x2f   :  { %s592_s11 = sld [smem:[#allocation2 + $0x2]] }
  0x30   :  { %s594_s12 = sld [smem:[#allocation2 + $0x3]] }
  0x31   :  { %s596_s13 = sld [smem:[#allocation2 + $0x4]] }
  0x32   :  { %s598_s14 = sld [smem:[#allocation2 + $0x5]] }
  0x33   :  { %s600_s15 = sld [smem:[#allocation2 + $0x6]]  ;;  %v149_v1 = vstv %s588_s3 }
  0x34   :  { %s602_s16 = sld [smem:[#allocation2 + $0x7]]  ;;  %v169_v2 = vstv %s590_s10  ;;  %v150_v9 = vmul.f32 %v149_v1, %v142_v0 }
  0x35   :  { %s604_s17 = sld [smem:[#allocation2 + $0x8]]  ;;  %v189_v5 = vstv %s592_s11  ;;  %v170_v10 = vmul.f32 %v169_v2, %v142_v0 }
  0x36   :  { %s606_s18 = sld [smem:[#allocation2 + $0x9]]  ;;  %v209_v6 = vstv %s594_s12  ;;  %v190_v13 = vmul.f32 %v189_v5, %v142_v0 }
  0x37   :  { %s608_s19 = sld [smem:[#allocation2 + $0x80]]  ;;  %v229_v8 = vstv %s596_s13  ;;  %v210_v15 = vmul.f32 %v209_v6, %v142_v0 }
  0x38   :  { %s610_s20 = sld [smem:[#allocation2 + $0x81]]  ;;  %v249_v11 = vstv %s598_s14  ;;  %v230_v20 = vmul.f32 %v229_v8, %v142_v0 }
  0x39   :  { %s612_s21 = sld [smem:[#allocation2 + $0x82]]  ;;  %v250_v22 = vmul.f32 %v249_v11, %v142_v0  ;;  %v269_v24 = vstv %s600_s15 }
  0x3a   :  { %s614_s22 = sld [smem:[#allocation2 + $0x83]]  ;;  %v289_v27 = vstv %s602_s16  ;;  %v270_v36 = vmul.f32 %v269_v24, %v142_v0 }
  0x3b   :  { %s616_s25 = sld [smem:[#allocation2 + $0x84]]  ;;  %v309_v28 = vstv %s604_s17  ;;  %v290_v42 = vmul.f32 %v289_v27, %v142_v0 }
  0x3c   :  { %s618_s26 = sld [smem:[#allocation2 + $0x85]]  ;;  %v329_v32 = vstv %s606_s18  ;;  %v310_v43 = vmul.f32 %v309_v28, %v142_v0 }
  0x3d   :  { %s620_s27 = sld [smem:[#allocation2 + $0x86]]  ;;  %v151_v4 = vstv %s608_s19  ;;  %v330_v44 = vmul.f32 %v329_v32, %v142_v0 }
  0x3e   :  { %s622_s2 = sld [smem:[#allocation2 + $0x87]]  ;;  %v171_v7 = vstv %s610_s20  ;;  %v152_v12 = vmul.f32 %v648_v3, %v151_v4 }
  0x3f   :  { %s624_s28 = sld [smem:[#allocation2 + $0x88]]  ;;  %v191_v14 = vstv %s612_s21  ;;  %v172_v18 = vmul.f32 %v648_v3, %v171_v7 }
  0x40   :  { %s626_s29 = sld [smem:[#allocation2 + $0x89]]  ;;  %v211_v19 = vstv %s614_s22  ;;  %v192_v26 = vmul.f32 %v648_v3, %v191_v14  ;;  %v153_v29 = vadd.f32 %v152_v12, %v150_v9 }
  0x41   :  { %s628_s30 = sld [smem:[#allocation2 + $0x100]]  ;;  %v231_v21 = vstv %s616_s25  ;;  %v212_v31 = vmul.f32 %v648_v3, %v211_v19  ;;  %v173_v33 = vadd.f32 %v172_v18, %v170_v10 }
  0x42   :  { %s630_s6 = sld [smem:[#allocation2 + $0x101]]  ;;  %v251_v23 = vstv %s618_s26  ;;  %v232_v34 = vmul.f32 %v648_v3, %v231_v21  ;;  %v193_v41 = vadd.f32 %v192_v26, %v190_v13 }
  0x43   :  { %s632_s7 = sld [smem:[#allocation2 + $0x102]]  ;;  %v252_v35 = vmul.f32 %v648_v3, %v251_v23  ;;  %v271_v39 = vstv %s620_s27  ;;  %v213_v46 = vadd.f32 %v212_v31, %v210_v15 }
  0x44   :  { %s634_s8 = sld [smem:[#allocation2 + $0x103]]  ;;  %v291_v40 = vstv %s622_s2  ;;  %v272_v51 = vmul.f32 %v648_v3, %v271_v39  ;;  %v233_v54 = vadd.f32 %v232_v34, %v230_v20 }
  0x45   :  { %s636_s9 = sld [smem:[#allocation2 + $0x104]]  ;;  %v311_v48 = vstv %s624_s28  ;;  %v292_v52 = vmul.f32 %v648_v3, %v291_v40  ;;  %v253_v55 = vadd.f32 %v252_v35, %v250_v22 }
  0x46   :  { %846 = sst [smem:[#allocation15_spill]] %s626_s29  ;;  %v312_v60 = vmul.f32 %v648_v3, %v311_v48  ;;  %v273_v2 = vadd.f32 %v272_v51, %v270_v36 }
  0x47   :  { %s643_s23 = sld [smem:[#allocation2 + $0x105]]  ;;  %v154_v17 = vstv %s628_s30  ;;  %v293_v4 = vadd.f32 %v292_v52, %v290_v42 }
  0x48   :  { %s653_s29 = sld [smem:[#allocation2 + $0x106]]  ;;  %v174_v25 = vstv %s630_s6  ;;  %v155_v30 = vmul.f32 %v669_v16, %v154_v17  ;;  %v313_v15 = vadd.f32 %v312_v60, %v310_v43 }
  0x49   :  { %s657_s0 = sld [smem:[#allocation2 + $0x107]]  ;;  %v175_v37 = vmul.f32 %v669_v16, %v174_v25  ;;  %v194_v38 = vstv %s632_s7 }
  0x4a   :  { %s660_s5 = sld [smem:[#allocation2 + $0x108]]  ;;  %v156_v45 = vadd.f32 %v155_v30, %v153_v29  ;;  %v214_v47 = vstv %s634_s8  ;;  %v195_v50 = vmul.f32 %v669_v16, %v194_v38 }
  0x4b   :  { %s664_s24 = sld [smem:[#allocation2 + $0x109]]  ;;  %v176_v53 = vadd.f32 %v175_v37, %v173_v33  ;;  %v215_v58 = vmul.f32 %v669_v16, %v214_v47  ;;  %v234_v59 = vstv %s636_s9 }
  0x4c   :  { %s674_s11 = sld [smem:[#allocation6]]  ;;  %v196_v1 = vadd.f32 %v195_v50, %v193_v41  ;;  %v235_v8 = vmul.f32 %v669_v16, %v234_v59 }
  0x4d   :  { %s679_s12 = sld [smem:[#allocation6 + $0x1]]  ;;  %v254_v62 = vstv %s643_s23  ;;  %v216_v14 = vadd.f32 %v215_v58, %v213_v46 }
  0x4e   :  { %s685_s4 = sld [smem:[#allocation6 + $0x2]]  ;;  %v274_v63 = vstv %s653_s29  ;;  %v255_v10 = vmul.f32 %v669_v16, %v254_v62  ;;  %v236_v23 = vadd.f32 %v235_v8, %v233_v54 }
  0x4f   :  { %s690_s13 = sld [smem:[#allocation6 + $0x3]]  ;;  %v294_v0 = vstv %s657_s0  ;;  %v275_v11 = vmul.f32 %v669_v16, %v274_v63 }
  0x50   :  { %s694_s14 = sld [smem:[#allocation6 + $0x4]]  ;;  %v314_v9 = vstv %s660_s5  ;;  %v295_v12 = vmul.f32 %v669_v16, %v294_v0  ;;  %v256_v26 = vadd.f32 %v255_v10, %v253_v55 }
  0x51   :  { %s700_s15 = sld [smem:[#allocation6 + $0x5]]  ;;  %v334_v13 = vstv %s664_s24  ;;  %v315_v19 = vmul.f32 %v669_v16, %v314_v9  ;;  %v276_v27 = vadd.f32 %v275_v11, %v273_v2 }
  0x52   :  { %s847_s16 = sld [smem:[#allocation15_spill]]  ;;  %v157_v49 = vstv %s674_s11  ;;  %v335_v24 = vmul.f32 %v669_v16, %v334_v13  ;;  %v753_v28 = vadd.f32 %v295_v12, %v293_v4 }
  0x53   :  { %s702_s17 = sld [smem:[#allocation6 + $0x6]]  ;;  %v177_v57 = vstv %s679_s12  ;;  %v158_v61 = vadd.f32 %v157_v49, %v156_v45  ;;  %v762_v35 = vadd.f32 %v315_v19, %v313_v15 }
  0x54   :  { %s706_s18 = sld [smem:[#allocation6 + $0x7]]  ;;  %v178_v6 = vadd.f32 %v177_v57, %v176_v53  ;;  %v197_v7 = vstv %s685_s4 }
  0x55   :  { %s712_s19 = sld [smem:[#allocation6 + $0x8]]  ;;  %v198_v17 = vadd.f32 %v197_v7, %v196_v1  ;;  %v217_v18 = vstv %s690_s13 }
  0x56   :  { %s715_s20 = sld [smem:[#allocation6 + $0x9]]  ;;  %v179_v22 = vmax.f32 %v178_v6, 0.0  ;;  %v218_v31 = vadd.f32 %v217_v18, %v216_v14  ;;  %v237_v32 = vstv %s694_s14 }
  0x57   :  { %s721_s21 = sld [smem:[#allocation7]]  ;;  %v199_v34 = vmax.f32 %v198_v17, 0.0  ;;  %v238_v42 = vadd.f32 %v237_v32, %v236_v23  ;;  %v257_v43 = vstv %s700_s15 }
  0x58   :  { %v331_v56 = vstv %s847_s16  ;;  %s726_s22 = sld [smem:[#allocation7 + $0x1]]  ;;  %v219_v47 = vmax.f32 %v218_v31, 0.0  ;;  %v258_v55 = vadd.f32 %v257_v43, %v256_v26 }
  0x59   :  { %v332_v5 = vmul.f32 %v648_v3, %v331_v56  ;;  %s729_s25 = sld [smem:[#allocation7 + $0x2]]  ;;  %v159_v3 = vmax.f32 %v158_v61, 0.0  ;;  %v277_v51 = vstv %s702_s17  ;;  %v239_v59 = vmax.f32 %v238_v42, 0.0 }
  0x5a   :  { %s734_s23 = sld [smem:[#allocation7 + $0x80]]  ;;  %v278_v63 = vadd.f32 %v277_v51, %v276_v27  ;;  %v297_v4 = vstv %s706_s18  ;;  %v259_v8 = vmax.f32 %v258_v55, 0.0 }
  0x5b   :  { %s740_s26 = sld [smem:[#allocation7 + $0x81]]  ;;  %v333_v20 = vadd.f32 %v332_v5, %v330_v44  ;;  %v317_v12 = vstv %s712_s19  ;;  %v298_v15 = vadd.f32 %v297_v4, %v753_v28 }
  0x5c   :  { %s742_s27 = sld [smem:[#allocation7 + $0x82]]  ;;  %v337_v28 = vstv %s715_s20 }
  0x5d   :  { %s746_s2 = sld [smem:[#allocation7 + $0x100]]  ;;  %v160_v21 = vstv %s721_s21  ;;  %v767_v39 = vadd.f32 %v335_v24, %v333_v20  ;;  %v279_v20 = vmax.f32 %v278_v63, 0.0  ;;  %v318_v24 = vadd.f32 %v317_v12, %v762_v35 }
  0x5e   :  { %s750_s28 = sld [smem:[#allocation7 + $0x101]]  ;;  %v163_v25 = vstv %s726_s22  ;;  %v161_v29 = vmul.f32 %v160_v21, %v159_v3  ;;  %v299_v32 = vmax.f32 %v298_v15, 0.0 }
  0x5f   :  { %s755_s29 = sld [smem:[#allocation7 + $0x102]]  ;;  %v166_v30 = vstv %s729_s25  ;;  %v164_v33 = vmul.f32 %v163_v25, %v159_v3  ;;  %v319_v43 = vmax.f32 %v318_v24, 0.0  ;;  %s542_s25 = smov [#allocation10]  }
  0x60   :  { %s759_s30 = sld [smem:[#allocation7 + $0x180]]  ;;  %v180_v16 = vstv %s734_s23  ;;  %v167_v36 = vmul.f32 %v166_v30, %v159_v3  ;;  %s368_s23 = sshll.u32 %s542_s25, 4  ;;  %s369_s23 = int_to_ptr.vmem [resolvable:$true] %s368_s23 }
  0x61   :  { %s764_s6 = sld [smem:[#allocation7 + $0x181]]  ;;  %v181_v37 = vmul.f32 %v180_v16, %v179_v22  ;;  %v183_v38 = vstv %s740_s26  ;;  %s508_s26 = scalar_lea.vmem %s369_s23, 384 }
  0x62   :  { %s769_s7 = sld [smem:[#allocation7 + $0x182]]  ;;  %v184_v40 = vmul.f32 %v183_v38, %v179_v22  ;;  %v186_v41 = vstv %s742_s27  ;;  %v338_v38 = vadd.f32 %v337_v28, %v767_v39  ;;  %p509_p1 = scmp.ne.s32.totalorder %s369_s23, %s508_s26 }
  0x63   :  { %s773_s8 = sld [smem:[#allocation7 + $0x200]]  ;;  %v182_v44 = vadd.f32 %v181_v37, %v161_v29  ;;  %v187_v45 = vmul.f32 %v186_v41, %v179_v22  ;;  %v200_v46 = vstv %s746_s2  ;;  %p513_p2 = scmp.lt.s32.totalorder %s369_s23, %s369_s23 }
  0x64   :  { %s776_s9 = sld [smem:[#allocation7 + $0x201]]  ;;  %v185_v48 = vadd.f32 %v184_v40, %v164_v33  ;;  %v201_v49 = vmul.f32 %v200_v46, %v199_v34  ;;  %v203_v50 = vstv %s750_s28  ;;  %p514_p3 = scmp.lt.s32.totalorder %s508_s26, %s508_s26 }
  0x65   :  { %s780_s1 = sld [smem:[#allocation7 + $0x202]]  ;;  %v188_v52 = vadd.f32 %v187_v45, %v167_v36  ;;  %v204_v53 = vmul.f32 %v203_v50, %v199_v34  ;;  %v206_v54 = vstv %s755_s29 }
  0x66   :  { %s783_s0 = sld [smem:[#allocation7 + $0x280]]  ;;  %v202_v56 = vadd.f32 %v201_v49, %v182_v44  ;;  %v207_v57 = vmul.f32 %v206_v54, %v199_v34  ;;  %v220_v58 = vstv %s759_s30  ;;  %p515_p4 = por %p514_p3, %p513_p2 }
  0x67   :  { %s786_s5 = sld [smem:[#allocation7 + $0x281]]  ;;  %v205_v60 = vadd.f32 %v204_v53, %v185_v48  ;;  %v221_v61 = vmul.f32 %v220_v58, %v219_v47  ;;  %v223_v62 = vstv %s764_s6 }
  0x68   :  { %s789_s24 = sld [smem:[#allocation7 + $0x282]]  ;;  %v208_v0 = vadd.f32 %v207_v57, %v188_v52  ;;  %v224_v1 = vmul.f32 %v223_v62, %v219_v47  ;;  %v226_v2 = vstv %s769_s7  ;;  %v339_v52 = vmax.f32 %v338_v38, 0.0  ;;  %p516_p5 = pnand %p515_p4, %p509_p1 }
  0x69   :  { %s793_s3 = sld [smem:[#allocation7 + $0x300]]  ;;  %v222_v5 = vadd.f32 %v221_v61, %v202_v56  ;;  %v227_v6 = vmul.f32 %v226_v2, %v219_v47  ;;  %v240_v7 = vstv %s773_s8 }
  0x6a   :  { %s796_s10 = sld [smem:[#allocation7 + $0x301]]  ;;  %v225_v9 = vadd.f32 %v224_v1, %v205_v60  ;;  %v241_v10 = vmul.f32 %v240_v7, %v239_v59  ;;  %v243_v11 = vstv %s776_s9 }
  0x6b   :  { %s800_s11 = sld [smem:[#allocation7 + $0x302]]  ;;  %v228_v13 = vadd.f32 %v227_v6, %v208_v0  ;;  %v244_v3 = vmul.f32 %v243_v11, %v239_v59  ;;  %v246_v14 = vstv %s780_s1 }
  0x6c   :  { %s804_s12 = sld [smem:[#allocation7 + $0x380]]  ;;  %v242_v17 = vadd.f32 %v241_v10, %v222_v5  ;;  %v247_v18 = vmul.f32 %v246_v14, %v239_v59  ;;  %v260_v19 = vstv %s783_s0 }
  0x6d   :  { %s807_s4 = sld [smem:[#allocation7 + $0x381]]  ;;  %v245_v21 = vadd.f32 %v244_v3, %v225_v9  ;;  %v261_v22 = vmul.f32 %v260_v19, %v259_v8  ;;  %v263_v23 = vstv %s786_s5 }
  0x6e   :  { %s811_s13 = sld [smem:[#allocation7 + $0x382]]  ;;  %v248_v25 = vadd.f32 %v247_v18, %v228_v13  ;;  %v264_v26 = vmul.f32 %v263_v23, %v259_v8  ;;  %v266_v27 = vstv %s789_s24 }
  0x6f   :  { %s815_s14 = sld [smem:[#allocation7 + $0x400]]  ;;  %v262_v29 = vadd.f32 %v261_v22, %v242_v17  ;;  %v267_v30 = vmul.f32 %v266_v27, %v259_v8  ;;  %v280_v31 = vstv %s793_s3 }
  0x70   :  { %s818_s15 = sld [smem:[#allocation7 + $0x401]]  ;;  %v265_v33 = vadd.f32 %v264_v26, %v245_v21  ;;  %v281_v16 = vmul.f32 %v280_v31, %v279_v20  ;;  %v283_v34 = vstv %s796_s10 }
  0x71   :  { %s821_s16 = sld [smem:[#allocation7 + $0x402]]  ;;  %v268_v35 = vadd.f32 %v267_v30, %v248_v25  ;;  %v284_v36 = vmul.f32 %v283_v34, %v279_v20  ;;  %v286_v37 = vstv %s800_s11 }
  0x72   :  { %s450_s17 = sld [smem:[#allocation7 + $0x480]]  ;;  %v282_v40 = vadd.f32 %v281_v16, %v262_v29  ;;  %v287_v41 = vmul.f32 %v286_v37, %v279_v20  ;;  %v300_v42 = vstv %s804_s12 }
  0x73   :  { %s451_s18 = sld [smem:[#allocation7 + $0x481]]  ;;  %v285_v44 = vadd.f32 %v284_v36, %v265_v33  ;;  %v301_v45 = vmul.f32 %v300_v42, %v299_v32  ;;  %v303_v46 = vstv %s807_s4 }
  0x74   :  { %s452_s19 = sld [smem:[#allocation7 + $0x482]]  ;;  %v288_v47 = vadd.f32 %v287_v41, %v268_v35  ;;  %v304_v48 = vmul.f32 %v303_v46, %v299_v32  ;;  %v306_v49 = vstv %s811_s13 }
  0x75   :  { %s139_s20 = sld [smem:[#allocation9]]  ;;  %v302_v50 = vadd.f32 %v301_v45, %v282_v40  ;;  %v307_v51 = vmul.f32 %v306_v49, %v299_v32  ;;  %v320_v39 = vstv %s815_s14 }
  0x76   :  { %s453_s21 = sld [smem:[#allocation9 + $0x1]]  ;;  %v305_v53 = vadd.f32 %v304_v48, %v285_v44  ;;  %v321_v54 = vmul.f32 %v320_v39, %v319_v43  ;;  %v323_v55 = vstv %s818_s15 }
  0x77   :  { %s454_s22 = sld [smem:[#allocation9 + $0x2]]  ;;  %v308_v56 = vadd.f32 %v307_v51, %v288_v47  ;;  %v324_v57 = vmul.f32 %v323_v55, %v319_v43  ;;  %v326_v58 = vstv %s821_s16 }
  0x78   :  { %v322_v59 = vadd.f32 %v321_v54, %v302_v50  ;;  %v327_v60 = vmul.f32 %v326_v58, %v319_v43  ;;  %v340_v61 = vstv %s450_s17 }
  0x79   :  { %v325_v62 = vadd.f32 %v324_v57, %v305_v53  ;;  %v341_v63 = vmul.f32 %v340_v61, %v339_v52  ;;  %v343_v0 = vstv %s451_s18 }
  0x7a   :  { %v328_v1 = vadd.f32 %v327_v60, %v308_v56  ;;  %v344_v2 = vmul.f32 %v343_v0, %v339_v52  ;;  %v346_v4 = vstv %s452_s19 }
  0x7b   :  { %v342_v5 = vadd.f32 %v341_v63, %v322_v59  ;;  %v347_v6 = vmul.f32 %v346_v4, %v339_v52  ;;  %v349_v7 = vstv %s139_s20 }
  0x7c   :  { %v345_v8 = vadd.f32 %v344_v2, %v325_v62  ;;  %v353_v9 = vstv %s453_s21 }
  0x7d   :  { %v348_v10 = vadd.f32 %v347_v6, %v328_v1  ;;  %v350_v11 = vadd.f32 %v349_v7, %v342_v5  ;;  %v358_v12 = vstv %s454_s22 }
  0x7e   :  { %v354_v13 = vadd.f32 %v353_v9, %v345_v8 }
  0x7f   :  { %v351_v3 = vmax.f32 %v350_v11, 0.0  ;;  %v359_v14 = vadd.f32 %v358_v12, %v348_v10 }
  0x80   :  { %v355_v15 = vmax.f32 %v354_v13, 0.0 }
  0x81   :  { %352 = vst [vmem:[#allocation10] sm:$0xff] %v351_v3  ;;  %v360_v17 = vmax.f32 %v359_v14, 0.0 }
  0x82   :  { %357 = vst [vmem:[#allocation10 + $0x8] sm:$0xff] %v355_v15 }
  0x83   :  { %362 = vst [vmem:[#allocation10 + $0x10] sm:$0xff] %v360_v17 }
  0x84   :  { %519 = shalt.err (!%p516_p5)
}
  0x85   :  { %s848_s27 = smov 8   ;;  %s849_s2 = smov 128  }
  0x86   :  { %s850_s30 = sld [smem:[#allocation16_spill]] }
  0x8c   :  { %374 = dma.vmem_to_hbm [thread:$0]  %s369_s23, 384, %s850_s30, [#allocation3], %s849_s2, %s849_s2, %s848_s27  }
  0x8d   :  { %534 = dma.done.wait [#allocation3], 384  }
  0x8e   :  { %535 = vsyncadd [#allocation3], 4294966912 }
  0x8f   :  { %378 = vsyncpa [#allocation3], 1 }
  0x90   :  { %379 = vsyncpa [#allocation4], 1 }
  0x91   :  { %380 = vsyncpa [#allocation5], 1 }
  0x92   :  { %381 = vsyncpa [#allocation8], 1 }

</bundles_post_ra>
